<compile_context>
chip_gen: v7x
topology: tpu7x:2x2x1
jax: 0.10.0
libtpu: 0.0.40
codegen_flags: <defaults>
</compile_context>

<pallas_src>
import functools

import jax
import jax.numpy as jnp
from jax.experimental import pallas as pl
from jax.experimental.pallas import tpu as pltpu

LANE = 128          # padded feature width for hidden layers (all layer dims <= 128)
NUM_LAYERS = 4


def _round_up(n, m):
    return ((n + m - 1) // m) * m


def qnetwork_kernel(x_ref, w_ref, b_ref, o_ref, *, state_size, action_size):
    """One batch tile of the 4-layer MLP.

    x_ref: (TB, S)  compute dtype    -- raw states (no lane padding)
    w_ref: (4, 128, 128) compute dt  -- packed zero-padded weights ([in, out] layout)
    b_ref: (4, 128) f32              -- packed zero-padded biases
    o_ref: (TB, A) f32               -- Q-values
    """
    x = x_ref[...]                                   # (TB, S)
    b = b_ref[...]                                   # (4, 128) f32, loaded once
    # Layer 0: contract only over the S valid input features (K = S matmul).
    # No padded activation is manufactured, so stale VMEM lanes cannot poison it.
    w0 = w_ref[0][:state_size, :]                    # (S, 128)
    acc = jnp.dot(x, w0, preferred_element_type=jnp.float32)
    acc = acc + b[0][None, :]                        # bias add in f32
    h = jnp.maximum(acc, 0.0).astype(x.dtype)        # ReLU f32, MXU dtype for next dot
    for layer in range(1, NUM_LAYERS):               # statically unrolled (3 more layers)
        acc = jnp.dot(h, w_ref[layer], preferred_element_type=jnp.float32)
        acc = acc + b[layer][None, :]
        if layer < NUM_LAYERS - 1:
            h = jnp.maximum(acc, 0.0).astype(x.dtype)
    o_ref[...] = acc[:, :action_size].astype(o_ref.dtype)   # narrow (TB, A) store


def qnetwork_forward(x, w_slab, b_slab, action_size, *, block_b=1024,
                     compute_dtype=jnp.bfloat16):
    """x: [B, state_size]. Returns [B, action_size] f32 Q-values."""
    B, S = x.shape
    assert S <= LANE, "state_size must be <= 128 for this packed-lane kernel"

    # Batch tile: sublane-aligned, large to amortize per-grid-step overhead,
    # clamped so batches >= 16 yield >= 2 grid steps (v7x: 2 TensorCores).
    TB = min(block_b, _round_up(B, 8))
    if B >= 16:
        TB = min(TB, _round_up(pl.cdiv(B, 2), 8))
    TB = max(TB, 8)
    Bp = pl.cdiv(B, TB) * TB

    # Cast to the MXU dtype BEFORE the DMA; pad only the batch tail (lanes untouched).
    xp = x.astype(compute_dtype)
    if Bp != B:
        xp = jnp.pad(xp, ((0, Bp - B), (0, 0)))

    kernel = functools.partial(qnetwork_kernel, state_size=S,
                               action_size=action_size)
    out = pl.pallas_call(
        kernel,
        out_shape=jax.ShapeDtypeStruct((Bp, action_size), jnp.float32),
        grid=(Bp // TB,),
        in_specs=[
            pl.BlockSpec((TB, S), lambda i: (i, 0)),                      # x: streamed, narrow
            pl.BlockSpec((NUM_LAYERS, LANE, LANE), lambda i: (0, 0, 0)),  # W: resident
            pl.BlockSpec((NUM_LAYERS, LANE), lambda i: (0, 0)),           # b: resident
        ],
        out_specs=pl.BlockSpec((TB, action_size), lambda i: (i, 0)),
        compiler_params=pltpu.CompilerParams(
            dimension_semantics=("parallel",)),                           # v7x: 2 TCs
    )(xp, w_slab, b_slab)

    return out[:B] if Bp != B else out


def init_params(key, state_size, action_size, layers=(64, 128, 64)):
    """nn.Linear-style init: U(-1/sqrt(fan_in), 1/sqrt(fan_in)).
    Weights stored as [in, out] (transposed vs PyTorch) so layers are x @ W + b."""
    dims = [state_size, layers[0], layers[1], layers[2], action_size]
    params = []
    for i in range(NUM_LAYERS):
        fan_in, fan_out = dims[i], dims[i + 1]
        key, kw, kb = jax.random.split(key, 3)
        bound = 1.0 / jnp.sqrt(jnp.float32(fan_in))
        w = jax.random.uniform(kw, (fan_in, fan_out), jnp.float32, -bound, bound)
        b = jax.random.uniform(kb, (fan_out,), jnp.float32, -bound, bound)
        params.append((w, b))
    return params


def pack_params(params, compute_dtype=jnp.bfloat16):
    """Pack all layers into one zero-padded weight slab + one bias slab."""
    w_slab = jnp.zeros((NUM_LAYERS, LANE, LANE), jnp.float32)
    b_slab = jnp.zeros((NUM_LAYERS, LANE), jnp.float32)
    for i, (w, b) in enumerate(params):
        assert w.shape[0] <= LANE and w.shape[1] <= LANE
        w_slab = w_slab.at[i, :w.shape[0], :w.shape[1]].set(w)
        b_slab = b_slab.at[i, :b.shape[0]].set(b)
    return w_slab.astype(compute_dtype), b_slab


def reference_forward(x, params):
    (w1, b1), (w2, b2), (w3, b3), (w4, b4) = params
    h = jnp.maximum(x @ w1 + b1, 0.0)
    h = jnp.maximum(h @ w2 + b2, 0.0)
    h = jnp.maximum(h @ w3 + b3, 0.0)
    return h @ w4 + b4


if __name__ == "__main__":
    key = jax.random.PRNGKey(0)
    state_size = 8
    action_size = 4

    key, kparams = jax.random.split(key)
    params = init_params(kparams, state_size, action_size)
    w_slab, b_slab = pack_params(params, compute_dtype=jnp.bfloat16)

    # Small-batch check (single grid step, padded batch tail).
    key, kx = jax.random.split(key)
    x_small = jax.random.normal(kx, (2, state_size), jnp.float32)
    out_small = jax.block_until_ready(
        qnetwork_forward(x_small, w_slab, b_slab, action_size))
    ref_small = reference_forward(x_small, params)
    assert out_small.shape == (2, action_size)
    assert jnp.allclose(out_small, ref_small, atol=5e-2, rtol=5e-2), (
        f"max abs err {jnp.max(jnp.abs(out_small - ref_small))}")

    # Larger batch: exercises >= 2 grid steps (v7x path) + padded tail block.
    key, kx2 = jax.random.split(key)
    x_big = jax.random.normal(kx2, (300, state_size), jnp.float32)
    out_big = jax.block_until_ready(
        qnetwork_forward(x_big, w_slab, b_slab, action_size))
    ref_big = reference_forward(x_big, params)
    assert out_big.shape == (300, action_size)
    assert jnp.allclose(out_big, ref_big, atol=5e-2, rtol=5e-2), (
        f"max abs err {jnp.max(jnp.abs(out_big - ref_big))}")

    print("KERNEL_OK")
</pallas_src>

<mosaic_0001>
module attributes {stable_mosaic.version = 11 : i64} {
  func.func @qnetwork_kernel(%arg0: i32, %arg1: memref<8x8xbf16, #tpu.memory_space<vmem>>, %arg2: memref<4x128x128xbf16, #tpu.memory_space<vmem>>, %arg3: memref<4x128xf32, #tpu.memory_space<vmem>>, %arg4: memref<8x4xf32, #tpu.memory_space<vmem>>) attributes {dimension_semantics = [#tpu.dimension_semantics<parallel>], iteration_bounds = array<i64: 1>, scalar_prefetch = 0 : i64, scratch_operands = 0 : i64, tpu.core_type = #tpu.core_type<tc>, window_params = [{transform_indices = @transform_0, window_bounds = array<i64: 8, 8>}, {pipeline_mode = #tpu.pipeline_mode<synchronous>, transform_indices = @transform_1, window_bounds = array<i64: 4, 128, 128>}, {pipeline_mode = #tpu.pipeline_mode<synchronous>, transform_indices = @transform_2, window_bounds = array<i64: 4, 128>}, {transform_indices = @transform_3, window_bounds = array<i64: 8, 4>}]} {
    %c0 = arith.constant 0 : index
    %c0_0 = arith.constant 0 : index
    %0 = vector.load %arg1[%c0, %c0_0] : memref<8x8xbf16, #tpu.memory_space<vmem>>, vector<8x8xbf16>
    %c0_1 = arith.constant 0 : index
    %c0_2 = arith.constant 0 : index
    %1 = vector.load %arg3[%c0_1, %c0_2] : memref<4x128xf32, #tpu.memory_space<vmem>>, vector<4x128xf32>
    %c0_3 = arith.constant 0 : index
    %c0_4 = arith.constant 0 : index
    %c0_5 = arith.constant 0 : index
    %2 = vector.load %arg2[%c0_3, %c0_4, %c0_5] : memref<4x128x128xbf16, #tpu.memory_space<vmem>>, vector<1x128x128xbf16>
    %3 = vector.shape_cast %2 : vector<1x128x128xbf16> to vector<128x128xbf16>
    %4 = vector.extract_strided_slice %3 {offsets = [0, 0], sizes = [8, 128], strides = [1, 1]} : vector<128x128xbf16> to vector<8x128xbf16>
    %cst = arith.constant dense<0.000000e+00> : vector<8x128xf32>
    %5 = tpu.matmul %0, %4, %cst {dimension_numbers = #tpu.dot_dimension_numbers<[1], [0], [0], [1], [0, 0, 1, 1], [], []>} : vector<8x8xbf16>, vector<8x128xbf16>, vector<8x128xf32> -> vector<8x128xf32>
    %6 = vector.extract_strided_slice %1 {offsets = [0, 0], sizes = [1, 128], strides = [1, 1]} : vector<4x128xf32> to vector<1x128xf32>
    %7 = vector.shape_cast %6 : vector<1x128xf32> to vector<128xf32>
    %8 = vector.shape_cast %7 : vector<128xf32> to vector<1x128xf32>
    %9 = vector.broadcast %8 : vector<1x128xf32> to vector<8x128xf32>
    %10 = arith.addf %5, %9 : vector<8x128xf32>
    %cst_6 = arith.constant 0.000000e+00 : f32
    %11 = vector.broadcast %cst_6 : f32 to vector<8x128xf32>
    %12 = arith.maximumf %10, %11 : vector<8x128xf32>
    %13 = arith.truncf %12 : vector<8x128xf32> to vector<8x128xbf16>
    %c1 = arith.constant 1 : index
    %c0_7 = arith.constant 0 : index
    %c0_8 = arith.constant 0 : index
    %14 = vector.load %arg2[%c1, %c0_7, %c0_8] : memref<4x128x128xbf16, #tpu.memory_space<vmem>>, vector<1x128x128xbf16>
    %15 = vector.shape_cast %14 : vector<1x128x128xbf16> to vector<128x128xbf16>
    %cst_9 = arith.constant dense<0.000000e+00> : vector<8x128xf32>
    %16 = tpu.matmul %13, %15, %cst_9 {dimension_numbers = #tpu.dot_dimension_numbers<[1], [0], [0], [1], [0, 0, 1, 1], [], []>} : vector<8x128xbf16>, vector<128x128xbf16>, vector<8x128xf32> -> vector<8x128xf32>
    %17 = vector.extract_strided_slice %1 {offsets = [1, 0], sizes = [1, 128], strides = [1, 1]} : vector<4x128xf32> to vector<1x128xf32>
    %18 = vector.shape_cast %17 : vector<1x128xf32> to vector<128xf32>
    %19 = vector.shape_cast %18 : vector<128xf32> to vector<1x128xf32>
    %20 = vector.broadcast %19 : vector<1x128xf32> to vector<8x128xf32>
    %21 = arith.addf %16, %20 : vector<8x128xf32>
    %cst_10 = arith.constant 0.000000e+00 : f32
    %22 = vector.broadcast %cst_10 : f32 to vector<8x128xf32>
    %23 = arith.maximumf %21, %22 : vector<8x128xf32>
    %24 = arith.truncf %23 : vector<8x128xf32> to vector<8x128xbf16>
    %c2 = arith.constant 2 : index
    %c0_11 = arith.constant 0 : index
    %c0_12 = arith.constant 0 : index
    %25 = vector.load %arg2[%c2, %c0_11, %c0_12] : memref<4x128x128xbf16, #tpu.memory_space<vmem>>, vector<1x128x128xbf16>
    %26 = vector.shape_cast %25 : vector<1x128x128xbf16> to vector<128x128xbf16>
    %cst_13 = arith.constant dense<0.000000e+00> : vector<8x128xf32>
    %27 = tpu.matmul %24, %26, %cst_13 {dimension_numbers = #tpu.dot_dimension_numbers<[1], [0], [0], [1], [0, 0, 1, 1], [], []>} : vector<8x128xbf16>, vector<128x128xbf16>, vector<8x128xf32> -> vector<8x128xf32>
    %28 = vector.extract_strided_slice %1 {offsets = [2, 0], sizes = [1, 128], strides = [1, 1]} : vector<4x128xf32> to vector<1x128xf32>
    %29 = vector.shape_cast %28 : vector<1x128xf32> to vector<128xf32>
    %30 = vector.shape_cast %29 : vector<128xf32> to vector<1x128xf32>
    %31 = vector.broadcast %30 : vector<1x128xf32> to vector<8x128xf32>
    %32 = arith.addf %27, %31 : vector<8x128xf32>
    %cst_14 = arith.constant 0.000000e+00 : f32
    %33 = vector.broadcast %cst_14 : f32 to vector<8x128xf32>
    %34 = arith.maximumf %32, %33 : vector<8x128xf32>
    %35 = arith.truncf %34 : vector<8x128xf32> to vector<8x128xbf16>
    %c3 = arith.constant 3 : index
    %c0_15 = arith.constant 0 : index
    %c0_16 = arith.constant 0 : index
    %36 = vector.load %arg2[%c3, %c0_15, %c0_16] : memref<4x128x128xbf16, #tpu.memory_space<vmem>>, vector<1x128x128xbf16>
    %37 = vector.shape_cast %36 : vector<1x128x128xbf16> to vector<128x128xbf16>
    %cst_17 = arith.constant dense<0.000000e+00> : vector<8x128xf32>
    %38 = tpu.matmul %35, %37, %cst_17 {dimension_numbers = #tpu.dot_dimension_numbers<[1], [0], [0], [1], [0, 0, 1, 1], [], []>} : vector<8x128xbf16>, vector<128x128xbf16>, vector<8x128xf32> -> vector<8x128xf32>
    %39 = vector.extract_strided_slice %1 {offsets = [3, 0], sizes = [1, 128], strides = [1, 1]} : vector<4x128xf32> to vector<1x128xf32>
    %40 = vector.shape_cast %39 : vector<1x128xf32> to vector<128xf32>
    %41 = vector.shape_cast %40 : vector<128xf32> to vector<1x128xf32>
    %42 = vector.broadcast %41 : vector<1x128xf32> to vector<8x128xf32>
    %43 = arith.addf %38, %42 : vector<8x128xf32>
    %44 = vector.extract_strided_slice %43 {offsets = [0, 0], sizes = [8, 4], strides = [1, 1]} : vector<8x128xf32> to vector<8x4xf32>
    %c0_18 = arith.constant 0 : index
    %c0_19 = arith.constant 0 : index
    %45 = vector.load %arg4[%c0_18, %c0_19] : memref<8x4xf32, #tpu.memory_space<vmem>>, vector<8x4xf32>
    tpu.vector_store %arg4[%c0_18, %c0_19], %44 {strides = array<i32>} : memref<8x4xf32, #tpu.memory_space<vmem>>, vector<8x4xf32>,
    return
  }
  func.func @transform_0(%arg0: i32) -> (i32, i32) {
    %c0_i32 = arith.constant 0 : i32
    %c0_i32_0 = arith.constant 0 : i32
    return %arg0, %c0_i32 : i32, i32
  }
  func.func @transform_1(%arg0: i32) -> (i32, i32, i32) {
    %c0_i32 = arith.constant 0 : i32
    %c0_i32_0 = arith.constant 0 : i32
    %c0_i32_1 = arith.constant 0 : i32
    %c0_i32_2 = arith.constant 0 : i32
    return %c0_i32, %c0_i32_0, %c0_i32_1 : i32, i32, i32
  }
  func.func @transform_2(%arg0: i32) -> (i32, i32) {
    %c0_i32 = arith.constant 0 : i32
    %c0_i32_0 = arith.constant 0 : i32
    %c0_i32_1 = arith.constant 0 : i32
    return %c0_i32, %c0_i32_0 : i32, i32
  }
  func.func @transform_3(%arg0: i32) -> (i32, i32) {
    %c0_i32 = arith.constant 0 : i32
    %c0_i32_0 = arith.constant 0 : i32
    return %arg0, %c0_i32 : i32, i32
  }
}

</mosaic_0001>

<bundles_post_ra>
// kernel: tpu_custom_call.1
= control target key start
LH: loop header
LB: loop body
LE: loop exit
PB: predicated region body
PF: predicated region fallthrough
CT: control target
= control target key end

     0   :  { %8 = vsyncpa [#allocation3], 0  ;;  %s737_s0 = inlined_call_operand.hbm [shape: bf16[8,8], index: 0, kind: input, shape index: {}]   ;;  %s738_s1 = inlined_call_operand.hbm [shape: bf16[4,128,128], index: 1, kind: input, shape index: {}]   ;;  %s739_s2 = inlined_call_operand.vmem [shape: f32[4,128], index: 2, kind: input, shape index: {}]   ;;  %s740_s3 = inlined_call_operand.vmem [shape: f32[8,4], index: 3, kind: output, shape index: {}]  }
   0x1   :  { %9 = vsyncpa [#allocation5], 0  ;;  %s635_s12 = smov [#allocation2]   ;;  %s636_s14 = smov [#allocation4]  }
   0x2   :  { %s16_s13 = sshll.u32 %s635_s12, 4  ;;  %s25_s15 = sshll.u32 %s636_s14, 4  ;;  %s17_s13 = int_to_ptr.vmem [resolvable:$true] %s16_s13  ;;  %s661_s15 = int_to_ptr.vmem [resolvable:$true] %s25_s15 }
   0x3   :  { %s587_s18 = scalar_lea.hbm %s737_s0, 64 }
   0x4   :  { %p588_p0 = scmp.ne.s32.totalorder %s737_s0, %s587_s18  ;;  %p591_p1 = scmp.lt.u32.totalorder %s587_s18, %s737_s0 }
   0x6   :  { %p593_p2 = pnand %p591_p1, %p588_p0 }
   0x8   :  { %596 = shalt.err (!%p593_p2)
}
   0x9   :  { %s597_s23 = scalar_lea.vmem %s17_s13, 64  ;;  %p602_p4 = scmp.lt.s32.totalorder %s17_s13, %s17_s13 }
   0xa   :  { %p598_p3 = scmp.ne.s32.totalorder %s17_s13, %s597_s23  ;;  %p603_p5 = scmp.lt.s32.totalorder %s597_s23, %s597_s23 }
   0xc   :  { %p604_p6 = por %p603_p5, %p602_p4 }
   0xe   :  { %p605_p7 = pnand %p604_p6, %p598_p3 }
  0x10   :  { %608 = shalt.err (!%p605_p7)
}
  0x11   :  { %19 = dma.hbm_to_vmem [thread:$0]  %s737_s0, 64, %s17_s13, [#allocation3]  }
  0x12   :  { %s609_s28 = scalar_lea.hbm %s738_s1, 4096 }
  0x13   :  { %p610_p8 = scmp.ne.s32.totalorder %s738_s1, %s609_s28  ;;  %p613_p9 = scmp.lt.u32.totalorder %s609_s28, %s738_s1 }
  0x15   :  { %p615_p10 = pnand %p613_p9, %p610_p8 }
  0x17   :  { %618 = shalt.err (!%p615_p10)
}
  0x18   :  { %s619_s6 = scalar_lea.vmem %s661_s15, 4096  ;;  %p624_p12 = scmp.lt.s32.totalorder %s661_s15, %s661_s15 }
  0x19   :  { %p620_p11 = scmp.ne.s32.totalorder %s661_s15, %s619_s6  ;;  %p625_p13 = scmp.lt.s32.totalorder %s619_s6, %s619_s6 }
  0x1b   :  { %p626_p0 = por %p625_p13, %p624_p12 }
  0x1d   :  { %p627_p1 = pnand %p626_p0, %p620_p11 }
  0x1f   :  { %630 = shalt.err (!%p627_p1)
}
  0x20   :  { %s637_s0 = smov 64   ;;  %s638_s7 = smov 4  }
  0x21   :  { %31 = dma.hbm_to_vmem [thread:$0]  %s738_s1, 4096, %s661_s15, [#allocation5], %s637_s0, %s637_s0, %s638_s7  }
  0x22   :  { %631 = dma.done.wait [#allocation3], 64  }
  0x23   :  { %632 = vsyncadd [#allocation3], 4294967232 }
  0x24   :  { %633 = dma.done.wait [#allocation5], 4096  }
  0x25   :  { %634 = vsyncadd [#allocation5], 4294963200  ;;  %v639_v0 = vmov 0.0   ;;  %vm640_vm0 = vmmov 0   ;;  %vm52_vm1 = vcmask 1043456   ;;  %vm48_vm2 = vcmask 64512  }
  0x26   :  { %491 = vmatprep.subr.bf16.mxu0 %v639_v0  ;;  %493 = vmatprep.mubr.msk.bf16.mxu0 %vm640_vm0, %v639_v0  ;;  %v43_v1 = vld [vmem:[#allocation4] sm:$0xf]  ;;  %v41_v4 = vld [vmem:[#allocation2] sm:$0xf]  ;;  %v564_v5 = vld [vmem:[#allocation4 + $0x48] sm:$0xff]   ;;  %v44_v18 = vlaneseq  ;;  %vm429_vm3 = vcmask 31744  }
  0x27   :  { %497 = vmatprep.subr.bf16.mxu1 %v639_v0  ;;  %513 = vmatprep.mubr.msk.bf16.mxu1 %vm640_vm0, %v639_v0  ;;  %v54_v2 = vsel %vm52_vm1, %v43_v1, 0  ;;  %v563_v3 = vld [vmem:[#allocation4 + $0x40] sm:$0xff]   ;;  %v565_v6 = vld [vmem:[#allocation4 + $0x50] sm:$0xff]   ;;  %v566_v7 = vld [vmem:[#allocation4 + $0x58] sm:$0xff]  }
  0x28   :  { %492 = vmatpush3.bf16.msra.mxu0 %v54_v2  ;;  %498 = vmatpush3.bf16.msra.mxu1 %v563_v3  ;;  %v567_v8 = vld [vmem:[#allocation4 + $0x60] sm:$0xff]   ;;  %v568_v9 = vld [vmem:[#allocation4 + $0x68] sm:$0xff]   ;;  %v569_v10 = vld [vmem:[#allocation4 + $0x70] sm:$0xff]   ;;  %v715_v19 = vshrl.u32 %v44_v18, 7 }
  0x29   :  { %517 = vmatprep.subr.bf16.mxu0 %v639_v0  ;;  %499 = vmatprep.subr.bf16.mxu1 %v639_v0  ;;  %v570_v11 = vld [vmem:[#allocation4 + $0x78] sm:$0xff]   ;;  %v571_v12 = vld [vmem:[#allocation4 + $0x80] sm:$0xff]   ;;  %v572_v13 = vld [vmem:[#allocation4 + $0x88] sm:$0xff]  }
  0x2a   :  { %v573_v14 = vld [vmem:[#allocation4 + $0x90] sm:$0xff]   ;;  %v574_v15 = vld [vmem:[#allocation4 + $0x98] sm:$0xff]   ;;  %v575_v16 = vld [vmem:[#allocation4 + $0xa0] sm:$0xff]   ;;  %v46_v20 = vsub.s32 0, %v715_v19  ;;  %v117_v38 = vsub.s32 1, %v715_v19  ;;  %v228_v49 = vsub.s32 2, %v715_v19 }
  0x2b   :  { %494 = vmatmul.mubr.msk.bf16.vlgmr.msra.gmra.mrb[0].mxu0 %vm48_vm2, %v41_v4  ;;  %v576_v17 = vld [vmem:[#allocation4 + $0xa8] sm:$0xff]   ;;  %v42_v21 = vld [vmem:[%s739_s2] sm:$0xf]  ;;  %v578_v31 = vld [vmem:[#allocation4 + $0xb8] sm:$0xff]   ;;  %v339_v58 = vsub.s32 3, %v715_v19 }
  0x2c   :  { %533 = vmatprep.mubr.msk.bf16.mxu0 %vm640_vm0, %v639_v0  ;;  %500 = vmatpush3.bf16.msra.mxu1 %v564_v5  ;;  %v47_v22 = vrot.slane %v42_v21, %v46_v20  ;;  %v577_v30 = vld [vmem:[#allocation4 + $0xb0] sm:$0xff]   ;;  %v579_v32 = vld [vmem:[#allocation4 + $0xc0] sm:$0xff]   ;;  %v580_v33 = vld [vmem:[#allocation4 + $0xc8] sm:$0xff]   ;;  %v118_v39 = vrot.slane %v42_v21, %v117_v38  ;;  %v229_v50 = vrot.slane %v42_v21, %v228_v49 }
  0x2d   :  { %501 = vmatprep.subr.bf16.mxu1 %v639_v0  ;;  %518 = vmatpush3.bf16.msra.mxu0 %v571_v12  ;;  %v581_v34 = vld [vmem:[#allocation4 + $0xd0] sm:$0xff]   ;;  %v582_v35 = vld [vmem:[#allocation4 + $0xd8] sm:$0xff]   ;;  %v583_v36 = vld [vmem:[#allocation4 + $0xe0] sm:$0xff]   ;;  %v340_v59 = vrot.slane %v42_v21, %v339_v58 }
  0x2e   :  { %519 = vmatprep.subr.bf16.mxu0 %v639_v0  ;;  %v584_v37 = vld [vmem:[#allocation4 + $0xe8] sm:$0xff]   ;;  %v585_v47 = vld [vmem:[#allocation4 + $0xf0] sm:$0xff]   ;;  %v586_v48 = vld [vmem:[#allocation4 + $0xf8] sm:$0xff]  }
  0x30   :  { %502 = vmatpush3.bf16.msra.mxu1 %v565_v6 }
  0x31   :  { %503 = vmatprep.subr.bf16.mxu1 %v639_v0  ;;  %520 = vmatpush3.bf16.msra.mxu0 %v572_v13 }
  0x32   :  { %521 = vmatprep.subr.bf16.mxu0 %v639_v0 }
  0x34   :  { %504 = vmatpush3.bf16.msra.mxu1 %v566_v7 }
  0x35   :  { %505 = vmatprep.subr.bf16.mxu1 %v639_v0  ;;  %522 = vmatpush3.bf16.msra.mxu0 %v573_v14 }
  0x36   :  { %523 = vmatprep.subr.bf16.mxu0 %v639_v0 }
  0x38   :  { %506 = vmatpush3.bf16.msra.mxu1 %v567_v8 }
  0x39   :  { %507 = vmatprep.subr.bf16.mxu1 %v639_v0  ;;  %524 = vmatpush3.bf16.msra.mxu0 %v574_v15 }
  0x3a   :  { %525 = vmatprep.subr.bf16.mxu0 %v639_v0 }
  0x3c   :  { %508 = vmatpush3.bf16.msra.mxu1 %v568_v9 }
  0x3d   :  { %509 = vmatprep.subr.bf16.mxu1 %v639_v0  ;;  %526 = vmatpush3.bf16.msra.mxu0 %v575_v16 }
  0x3e   :  { %527 = vmatprep.subr.bf16.mxu0 %v639_v0 }
  0x40   :  { %510 = vmatpush3.bf16.msra.mxu1 %v569_v10 }
  0x41   :  { %511 = vmatprep.subr.bf16.mxu1 %v639_v0  ;;  %528 = vmatpush3.bf16.msra.mxu0 %v576_v17 }
  0x42   :  { %529 = vmatprep.subr.bf16.mxu0 %v639_v0 }
  0x44   :  { %512 = vmatpush3.bf16.msra.mxu1 %v570_v11 }
  0x45   :  { %537 = vmatprep.subr.bf16.mxu1 %v639_v0  ;;  %530 = vmatpush3.bf16.msra.mxu0 %v577_v30 }
  0x46   :  { %531 = vmatprep.subr.bf16.mxu0 %v639_v0 }
  0x49   :  { %532 = vmatpush3.bf16.msra.mxu0 %v578_v31 }
  0xfe   :  { %v90_v23 = vpop.f32.mrb[0].mxu0 }
  0xff   :  { %v91_v24 = vadd.f32 %v90_v23, %v47_v22  ;;  %v495_v25 = vpop.f32.mrb[1].mxu0 }
 0x100   :  { %v93_v26 = vpop.f32.mrb[2].mxu0 }
 0x101   :  { %v96_v27 = vmax.f32 %v91_v24, 0.0  ;;  %v496_v28 = vpop.f32.mrb[3].mxu0 }
 0x103   :  { %v97_v29 = vpack.c.bf16 %v96_v27, %v96_v27 }
 0x105   :  { %514 = vmatmul.mubr.bf16.vlgmr.msra.gmra.mrb[0].mxu1 %v97_v29 }
 0x106   :  { %553 = vmatprep.mubr.msk.bf16.mxu1 %vm640_vm0, %v639_v0  ;;  %538 = vmatpush3.bf16.msra.mxu1 %v579_v32 }
 0x107   :  { %539 = vmatprep.subr.bf16.mxu1 %v639_v0 }
 0x10a   :  { %540 = vmatpush3.bf16.msra.mxu1 %v580_v33 }
 0x10b   :  { %541 = vmatprep.subr.bf16.mxu1 %v639_v0 }
 0x10e   :  { %542 = vmatpush3.bf16.msra.mxu1 %v581_v34 }
 0x10f   :  { %543 = vmatprep.subr.bf16.mxu1 %v639_v0 }
 0x112   :  { %544 = vmatpush3.bf16.msra.mxu1 %v582_v35 }
 0x113   :  { %545 = vmatprep.subr.bf16.mxu1 %v639_v0 }
 0x116   :  { %546 = vmatpush3.bf16.msra.mxu1 %v583_v36 }
 0x117   :  { %547 = vmatprep.subr.bf16.mxu1 %v639_v0 }
 0x11a   :  { %548 = vmatpush3.bf16.msra.mxu1 %v584_v37 }
 0x11b   :  { %549 = vmatprep.subr.bf16.mxu1 %v639_v0 }
 0x11e   :  { %550 = vmatpush3.bf16.msra.mxu1 %v585_v47 }
 0x11f   :  { %551 = vmatprep.subr.bf16.mxu1 %v639_v0 }
 0x122   :  { %552 = vmatpush3.bf16.msra.mxu1 %v586_v48 }
 0x1d8   :  { %v201_v40 = vpop.f32.mrb[0].mxu1 }
 0x1d9   :  { %v202_v41 = vadd.f32 %v201_v40, %v118_v39  ;;  %v515_v42 = vpop.f32.mrb[1].mxu1 }
 0x1da   :  { %v204_v43 = vpop.f32.mrb[2].mxu1 }
 0x1db   :  { %v207_v44 = vmax.f32 %v202_v41, 0.0  ;;  %v516_v45 = vpop.f32.mrb[3].mxu1 }
 0x1dd   :  { %v208_v46 = vpack.c.bf16 %v207_v44, %v207_v44 }
 0x1df   :  { %534 = vmatmul.mubr.bf16.vlgmr.msra.gmra.mrb[4].mxu0 %v208_v46 }
 0x2b2   :  { %v312_v51 = vpop.f32.mrb[4].mxu0 }
 0x2b3   :  { %v313_v52 = vadd.f32 %v312_v51, %v229_v50  ;;  %v535_v53 = vpop.f32.mrb[5].mxu0 }
 0x2b4   :  { %v315_v54 = vpop.f32.mrb[6].mxu0 }
 0x2b5   :  { %v318_v55 = vmax.f32 %v313_v52, 0.0  ;;  %v536_v56 = vpop.f32.mrb[7].mxu0 }
 0x2b7   :  { %v319_v57 = vpack.c.bf16 %v318_v55, %v318_v55 }
 0x2b9   :  { %554 = vmatmul.mubr.bf16.vlgmr.msra.gmra.mrb[4].mxu1 %v319_v57 }
 0x38c   :  { %v423_v60 = vpop.f32.mrb[4].mxu1 }
 0x38d   :  { %v424_v61 = vadd.f32 %v423_v60, %v340_v59  ;;  %v555_v62 = vpop.f32.mrb[5].mxu1 }
 0x38e   :  { %v426_v63 = vpop.f32.mrb[6].mxu1 }
 0x38f   :  { %430 = vst.msk [vmem:[%s740_s3] sm:$0xff] %vm429_vm3, %v424_v61  ;;  %v556_v0 = vpop.f32.mrb[7].mxu1 }
 0x390   :  { %435 = vsyncpa [#allocation3], 1 }
 0x391   :  { %436 = vsyncpa [#allocation5], 1 }

</bundles_post_ra>
